<compile_context>
chip_gen: v5e
topology: v5e:2x2
jax: 0.10.0
libtpu: 0.0.40
codegen_flags: <defaults>
</compile_context>

<pallas_src>
import functools
import math

import jax
import jax.numpy as jnp
from jax.experimental import pallas as pl
from jax.experimental.pallas import tpu as pltpu


def _gelu(x):
    # tanh-approximate GELU (tanh lowers on the EUP on every TPU generation).
    # TODO(synk): PyTorch F.gelu defaults to the exact erf form; erf has no guaranteed
    # Mosaic lowering, and the tanh form differs from it by <~1e-3.
    c = math.sqrt(2.0 / math.pi)
    return 0.5 * x * (1.0 + jnp.tanh(c * (x + 0.044715 * (x * x * x))))


def _pointwise_conv(w, x):
    """1x1 conv, channels-first: (Cout, Cin) x (Cin, HW) -> (Cout, HW).

    For tiny Cin the MXU is almost entirely idle, so below the threshold we unroll into
    VPU broadcast-FMAs (keeps HW lane-dense, avoids MXU latency/drain); otherwise MXU.
    """
    cin = x.shape[0]
    if cin >= 128:
        return jnp.dot(w, x, preferred_element_type=jnp.float32)
    acc = w[:, 0:1] * x[0:1, :]
    for ci in range(1, cin):
        acc = acc + w[:, ci:ci + 1] * x[ci:ci + 1, :]
    return acc


def _shift_flat(a, s, hw):
    """b[:, p] = a[:, p + s] with zero fill out of range (s is a static Python int)."""
    if s == 0:
        return a
    ch = a.shape[0]
    if s > 0:
        return jnp.concatenate([a[:, s:], jnp.zeros((ch, s), a.dtype)], axis=1)
    return jnp.concatenate([jnp.zeros((ch, -s), a.dtype), a[:, :hw + s]], axis=1)


def _ffn_kernel(x_ref, w1_ref, w3_ref, w2_ref, o_ref, *, width):
    # Per grid step:
    #   x_ref : (1, C, HW)   w1_ref: (Ch, C)   w3_ref: (Ch, 9)   w2_ref: (C, Ch)
    #   o_ref : (1, C, HW)
    _, c, hw = x_ref.shape
    ch = w1_ref.shape[0]

    xf = x_ref[0].astype(jnp.float32)                         # (C, HW)

    # ---- 1x1 conv #1 + GELU ------------------------------------------------
    h = _gelu(_pointwise_conv(w1_ref[...], xf))               # (Ch, HW)

    # ---- depthwise 3x3, padding=1: 9 shifted FMAs on the flat spatial axis --
    w3 = w3_ref[...]                                          # (Ch, 9)
    col = jax.lax.broadcasted_iota(jnp.int32, (1, hw), 1) % width
    not_first_col = col != 0
    not_last_col = col != (width - 1)

    acc = jnp.zeros((ch, hw), jnp.float32)
    for kh in range(3):
        for kw in range(3):
            dh, dw = kh - 1, kw - 1
            t = _shift_flat(h, dh * width + dw, hw)
            if dw == 1:
                t = jnp.where(not_last_col, t, 0.0)           # mask row wrap at w=W-1
            elif dw == -1:
                t = jnp.where(not_first_col, t, 0.0)          # mask row wrap at w=0
            tap = w3[:, kh * 3 + kw: kh * 3 + kw + 1]         # (Ch, 1) per-channel tap
            acc = acc + tap * t
    h = _gelu(acc)                                            # (Ch, HW)

    # ---- 1x1 conv #2 ---------------------------------------------------------
    out = _pointwise_conv(w2_ref[...], h)                     # (C, HW)
    o_ref[0] = out.astype(o_ref.dtype)


def feedforward_forward(x, w1, w3, w2):
    """x: (N, C, H, W); w1: (Ch, C, 1, 1); w3: (Ch, 1, 3, 3); w2: (C, Ch, 1, 1).

    Matches FeedForward(dim=C, mult=Ch//C).forward(x) (NCHW in, NCHW out).
    """
    n, c, h, w = x.shape
    ch = w1.shape[0]
    assert w1.shape == (ch, c, 1, 1)
    assert w3.shape == (ch, 1, 3, 3)
    assert w2.shape == (c, ch, 1, 1)
    hw = h * w

    xf = x.reshape(n, c, hw)           # free: contiguous NCHW row-major
    w1m = w1.reshape(ch, c)
    w3m = w3.reshape(ch, 9)
    w2m = w2.reshape(c, ch)

    out = pl.pallas_call(
        functools.partial(_ffn_kernel, width=w),
        out_shape=jax.ShapeDtypeStruct((n, c, hw), x.dtype),
        grid_spec=pltpu.PrefetchScalarGridSpec(
            num_scalar_prefetch=0,
            grid=(n,),
            in_specs=[
                pl.BlockSpec((1, c, hw), lambda i: (i, 0, 0)),
                pl.BlockSpec((ch, c), lambda i: (0, 0)),
                pl.BlockSpec((ch, 9), lambda i: (0, 0)),
                pl.BlockSpec((c, ch), lambda i: (0, 0)),
            ],
            out_specs=pl.BlockSpec((1, c, hw), lambda i: (i, 0, 0)),
        ),
        compiler_params=pltpu.CompilerParams(
            dimension_semantics=("parallel",),
        ),
    )(xf, w1m, w3m, w2m)

    return out.reshape(n, c, h, w)


def init_weights(key, dim, mult=4):
    """PyTorch-style Conv2d default init (uniform(+-1/sqrt(fan_in)), bias=False)."""
    ch = dim * mult
    k1, k2, k3 = jax.random.split(key, 3)

    def u(k, shape, fan_in):
        b = 1.0 / math.sqrt(fan_in)
        return jax.random.uniform(k, shape, jnp.float32, minval=-b, maxval=b)

    w1 = u(k1, (ch, dim, 1, 1), dim * 1 * 1)   # pointwise dim -> dim*mult
    w3 = u(k2, (ch, 1, 3, 3), 1 * 3 * 3)       # depthwise 3x3, groups = dim*mult
    w2 = u(k3, (dim, ch, 1, 1), ch * 1 * 1)    # pointwise dim*mult -> dim
    return w1, w3, w2


def reference_forward(x, w1, w3, w2):
    """Pure-JAX reference of the module (f32 precision, same tanh GELU)."""
    dn = ("NCHW", "OIHW", "NCHW")
    hp = jax.lax.Precision.HIGHEST
    h = jax.lax.conv_general_dilated(x, w1, (1, 1), "VALID",
                                     dimension_numbers=dn, precision=hp)
    h = _gelu(h)
    h = jax.lax.conv_general_dilated(h, w3, (1, 1), ((1, 1), (1, 1)),
                                     dimension_numbers=dn,
                                     feature_group_count=w3.shape[0], precision=hp)
    h = _gelu(h)
    return jax.lax.conv_general_dilated(h, w2, (1, 1), "VALID",
                                        dimension_numbers=dn, precision=hp)


if __name__ == "__main__":
    key = jax.random.PRNGKey(0)
    kx, kw = jax.random.split(key)

    N, DIM, H, W = 2, 4, 16, 16            # dim=4, mult=4 -> hidden=16
    x = jax.random.normal(kx, (N, DIM, H, W), jnp.float32)
    w1, w3, w2 = init_weights(kw, DIM, mult=4)

    y = feedforward_forward(x, w1, w3, w2)
    y = jax.block_until_ready(y)

    y_ref = reference_forward(x, w1, w3, w2)
    assert y.shape == (N, DIM, H, W), y.shape
    max_err = float(jnp.max(jnp.abs(y - y_ref)))
    assert jnp.allclose(y, y_ref, atol=1e-4, rtol=1e-4), f"mismatch vs reference: {max_err}"

    print("KERNEL_OK")
</pallas_src>

<mosaic_0001>
module attributes {stable_mosaic.version = 11 : i64} {
  func.func @_ffn_kernel(%arg0: i32, %arg1: memref<1x4x256xf32, #tpu.memory_space<vmem>>, %arg2: memref<16x4xf32, #tpu.memory_space<vmem>>, %arg3: memref<16x9xf32, #tpu.memory_space<vmem>>, %arg4: memref<4x16xf32, #tpu.memory_space<vmem>>, %arg5: memref<1x4x256xf32, #tpu.memory_space<vmem>>) attributes {dimension_semantics = [#tpu.dimension_semantics<parallel>], iteration_bounds = array<i64: 2>, scalar_prefetch = 0 : i64, scratch_operands = 0 : i64, tpu.core_type = #tpu.core_type<tc>, window_params = [{transform_indices = @transform_0, window_bounds = array<i64: 1, 4, 256>}, {pipeline_mode = #tpu.pipeline_mode<synchronous>, transform_indices = @transform_1, window_bounds = array<i64: 16, 4>}, {pipeline_mode = #tpu.pipeline_mode<synchronous>, transform_indices = @transform_2, window_bounds = array<i64: 16, 9>}, {pipeline_mode = #tpu.pipeline_mode<synchronous>, transform_indices = @transform_3, window_bounds = array<i64: 4, 16>}, {transform_indices = @transform_4, window_bounds = array<i64: 1, 4, 256>}]} {
    %c0 = arith.constant 0 : index
    %c0_0 = arith.constant 0 : index
    %c0_1 = arith.constant 0 : index
    %0 = vector.load %arg1[%c0, %c0_0, %c0_1] : memref<1x4x256xf32, #tpu.memory_space<vmem>>, vector<1x4x256xf32>
    %1 = vector.shape_cast %0 : vector<1x4x256xf32> to vector<4x256xf32>
    %c0_2 = arith.constant 0 : index
    %c0_3 = arith.constant 0 : index
    %2 = vector.load %arg2[%c0_2, %c0_3] : memref<16x4xf32, #tpu.memory_space<vmem>>, vector<16x4xf32>
    %3 = vector.extract_strided_slice %2 {offsets = [0, 0], sizes = [16, 1], strides = [1, 1]} : vector<16x4xf32> to vector<16x1xf32>
    %4 = vector.extract_strided_slice %1 {offsets = [0, 0], sizes = [1, 256], strides = [1, 1]} : vector<4x256xf32> to vector<1x256xf32>
    %5 = vector.broadcast %3 : vector<16x1xf32> to vector<16x256xf32>
    %6 = vector.broadcast %4 : vector<1x256xf32> to vector<16x256xf32>
    %7 = arith.mulf %5, %6 : vector<16x256xf32>
    %8 = vector.extract_strided_slice %2 {offsets = [0, 1], sizes = [16, 1], strides = [1, 1]} : vector<16x4xf32> to vector<16x1xf32>
    %9 = vector.extract_strided_slice %1 {offsets = [1, 0], sizes = [1, 256], strides = [1, 1]} : vector<4x256xf32> to vector<1x256xf32>
    %10 = vector.broadcast %8 : vector<16x1xf32> to vector<16x256xf32>
    %11 = vector.broadcast %9 : vector<1x256xf32> to vector<16x256xf32>
    %12 = arith.mulf %10, %11 : vector<16x256xf32>
    %13 = arith.addf %7, %12 : vector<16x256xf32>
    %14 = vector.extract_strided_slice %2 {offsets = [0, 2], sizes = [16, 1], strides = [1, 1]} : vector<16x4xf32> to vector<16x1xf32>
    %15 = vector.extract_strided_slice %1 {offsets = [2, 0], sizes = [1, 256], strides = [1, 1]} : vector<4x256xf32> to vector<1x256xf32>
    %16 = vector.broadcast %14 : vector<16x1xf32> to vector<16x256xf32>
    %17 = vector.broadcast %15 : vector<1x256xf32> to vector<16x256xf32>
    %18 = arith.mulf %16, %17 : vector<16x256xf32>
    %19 = arith.addf %13, %18 : vector<16x256xf32>
    %20 = vector.extract_strided_slice %2 {offsets = [0, 3], sizes = [16, 1], strides = [1, 1]} : vector<16x4xf32> to vector<16x1xf32>
    %21 = vector.extract_strided_slice %1 {offsets = [3, 0], sizes = [1, 256], strides = [1, 1]} : vector<4x256xf32> to vector<1x256xf32>
    %22 = vector.broadcast %20 : vector<16x1xf32> to vector<16x256xf32>
    %23 = vector.broadcast %21 : vector<1x256xf32> to vector<16x256xf32>
    %24 = arith.mulf %22, %23 : vector<16x256xf32>
    %25 = arith.addf %19, %24 : vector<16x256xf32>
    %cst = arith.constant 5.000000e-01 : f32
    %26 = vector.broadcast %cst : f32 to vector<16x256xf32>
    %27 = arith.mulf %26, %25 : vector<16x256xf32>
    %28 = arith.mulf %25, %25 : vector<16x256xf32>
    %29 = arith.mulf %28, %25 : vector<16x256xf32>
    %cst_4 = arith.constant 4.471500e-02 : f32
    %30 = vector.broadcast %cst_4 : f32 to vector<16x256xf32>
    %31 = arith.mulf %30, %29 : vector<16x256xf32>
    %32 = arith.addf %25, %31 : vector<16x256xf32>
    %cst_5 = arith.constant 0.797884583 : f32
    %33 = vector.broadcast %cst_5 : f32 to vector<16x256xf32>
    %34 = arith.mulf %33, %32 : vector<16x256xf32>
    %35 = math.tanh %34 : vector<16x256xf32>
    %cst_6 = arith.constant 1.000000e+00 : f32
    %36 = vector.broadcast %cst_6 : f32 to vector<16x256xf32>
    %37 = arith.addf %36, %35 : vector<16x256xf32>
    %38 = arith.mulf %27, %37 : vector<16x256xf32>
    %c0_7 = arith.constant 0 : index
    %c0_8 = arith.constant 0 : index
    %39 = vector.load %arg3[%c0_7, %c0_8] : memref<16x9xf32, #tpu.memory_space<vmem>>, vector<16x9xf32>
    %40 = tpu.iota {dimensions = array<i32: 1>} : vector<1x256xi32>
    %c16_i32 = arith.constant 16 : i32
    %c0_i32 = arith.constant 0 : i32
    %41 = arith.cmpi eq, %c16_i32, %c0_i32 : i32
    %c1_i32 = arith.constant 1 : i32
    %42 = arith.select %41, %c1_i32, %c16_i32 : i32
    %43 = vector.broadcast %42 : i32 to vector<1x256xi32>
    %44 = arith.remsi %40, %43 : vector<1x256xi32>
    %c0_i32_9 = arith.constant 0 : i32
    %45 = vector.broadcast %c0_i32_9 : i32 to vector<1x256xi32>
    %46 = arith.cmpi ne, %44, %45 : vector<1x256xi32>
    %c0_i32_10 = arith.constant 0 : i32
    %47 = vector.broadcast %c0_i32_10 : i32 to vector<1x256xi32>
    %48 = arith.cmpi slt, %44, %47 : vector<1x256xi32>
    %c0_i32_11 = arith.constant 0 : i32
    %49 = arith.cmpi slt, %42, %c0_i32_11 : i32
    %50 = vector.broadcast %49 : i1 to vector<1x256xi1>
    %51 = vector.broadcast %50 : vector<1x256xi1> to vector<1x256xi1>
    %52 = arith.xori %48, %51 : vector<1x256xi1>
    %53 = arith.andi %52, %46 : vector<1x256xi1>
    %54 = vector.broadcast %42 : i32 to vector<1x256xi32>
    %55 = arith.addi %44, %54 : vector<1x256xi32>
    %56 = arith.select %53, %55, %44 : vector<1x256xi1>, vector<1x256xi32>
    %c0_i32_12 = arith.constant 0 : i32
    %57 = vector.broadcast %c0_i32_12 : i32 to vector<1x256xi32>
    %58 = arith.cmpi ne, %56, %57 : vector<1x256xi32>
    %c15_i32 = arith.constant 15 : i32
    %59 = vector.broadcast %c15_i32 : i32 to vector<1x256xi32>
    %60 = arith.cmpi ne, %56, %59 : vector<1x256xi32>
    %cst_13 = arith.constant 0.000000e+00 : f32
    %61 = vector.broadcast %cst_13 : f32 to vector<16x256xf32>
    %cst_14 = arith.constant 0.000000e+00 : f32
    %62 = vector.broadcast %cst_14 : f32 to vector<16x17xf32>
    %63 = vector.extract_strided_slice %38 {offsets = [0, 0], sizes = [16, 239], strides = [1, 1]} : vector<16x256xf32> to vector<16x239xf32>
    %64 = tpu.concatenate %62, %63 in 1 : vector<16x17xf32>, vector<16x239xf32> -> vector<16x256xf32>
    %cst_15 = arith.constant 0.000000e+00 : f32
    %65 = vector.shape_cast %58 : vector<1x256xi1> to vector<1x256xi1>
    %66 = vector.broadcast %65 : vector<1x256xi1> to vector<16x256xi1>
    %67 = vector.broadcast %cst_15 : f32 to vector<16x256xf32>
    %68 = arith.select %66, %64, %67 : vector<16x256xi1>, vector<16x256xf32>
    %69 = vector.extract_strided_slice %39 {offsets = [0, 0], sizes = [16, 1], strides = [1, 1]} : vector<16x9xf32> to vector<16x1xf32>
    %70 = vector.broadcast %69 : vector<16x1xf32> to vector<16x256xf32>
    %71 = arith.mulf %70, %68 : vector<16x256xf32>
    %72 = arith.addf %61, %71 : vector<16x256xf32>
    %cst_16 = arith.constant 0.000000e+00 : f32
    %73 = vector.broadcast %cst_16 : f32 to vector<16x16xf32>
    %74 = vector.extract_strided_slice %38 {offsets = [0, 0], sizes = [16, 240], strides = [1, 1]} : vector<16x256xf32> to vector<16x240xf32>
    %75 = tpu.concatenate %73, %74 in 1 : vector<16x16xf32>, vector<16x240xf32> -> vector<16x256xf32>
    %76 = vector.extract_strided_slice %39 {offsets = [0, 1], sizes = [16, 1], strides = [1, 1]} : vector<16x9xf32> to vector<16x1xf32>
    %77 = vector.broadcast %76 : vector<16x1xf32> to vector<16x256xf32>
    %78 = arith.mulf %77, %75 : vector<16x256xf32>
    %79 = arith.addf %72, %78 : vector<16x256xf32>
    %cst_17 = arith.constant 0.000000e+00 : f32
    %80 = vector.broadcast %cst_17 : f32 to vector<16x15xf32>
    %81 = vector.extract_strided_slice %38 {offsets = [0, 0], sizes = [16, 241], strides = [1, 1]} : vector<16x256xf32> to vector<16x241xf32>
    %82 = tpu.concatenate %80, %81 in 1 : vector<16x15xf32>, vector<16x241xf32> -> vector<16x256xf32>
    %cst_18 = arith.constant 0.000000e+00 : f32
    %83 = vector.shape_cast %60 : vector<1x256xi1> to vector<1x256xi1>
    %84 = vector.broadcast %83 : vector<1x256xi1> to vector<16x256xi1>
    %85 = vector.broadcast %cst_18 : f32 to vector<16x256xf32>
    %86 = arith.select %84, %82, %85 : vector<16x256xi1>, vector<16x256xf32>
    %87 = vector.extract_strided_slice %39 {offsets = [0, 2], sizes = [16, 1], strides = [1, 1]} : vector<16x9xf32> to vector<16x1xf32>
    %88 = vector.broadcast %87 : vector<16x1xf32> to vector<16x256xf32>
    %89 = arith.mulf %88, %86 : vector<16x256xf32>
    %90 = arith.addf %79, %89 : vector<16x256xf32>
    %cst_19 = arith.constant 0.000000e+00 : f32
    %91 = vector.broadcast %cst_19 : f32 to vector<16x1xf32>
    %92 = vector.extract_strided_slice %38 {offsets = [0, 0], sizes = [16, 255], strides = [1, 1]} : vector<16x256xf32> to vector<16x255xf32>
    %93 = tpu.concatenate %91, %92 in 1 : vector<16x1xf32>, vector<16x255xf32> -> vector<16x256xf32>
    %cst_20 = arith.constant 0.000000e+00 : f32
    %94 = vector.shape_cast %58 : vector<1x256xi1> to vector<1x256xi1>
    %95 = vector.broadcast %94 : vector<1x256xi1> to vector<16x256xi1>
    %96 = vector.broadcast %cst_20 : f32 to vector<16x256xf32>
    %97 = arith.select %95, %93, %96 : vector<16x256xi1>, vector<16x256xf32>
    %98 = vector.extract_strided_slice %39 {offsets = [0, 3], sizes = [16, 1], strides = [1, 1]} : vector<16x9xf32> to vector<16x1xf32>
    %99 = vector.broadcast %98 : vector<16x1xf32> to vector<16x256xf32>
    %100 = arith.mulf %99, %97 : vector<16x256xf32>
    %101 = arith.addf %90, %100 : vector<16x256xf32>
    %102 = vector.extract_strided_slice %39 {offsets = [0, 4], sizes = [16, 1], strides = [1, 1]} : vector<16x9xf32> to vector<16x1xf32>
    %103 = vector.broadcast %102 : vector<16x1xf32> to vector<16x256xf32>
    %104 = arith.mulf %103, %38 : vector<16x256xf32>
    %105 = arith.addf %101, %104 : vector<16x256xf32>
    %106 = vector.extract_strided_slice %38 {offsets = [0, 1], sizes = [16, 255], strides = [1, 1]} : vector<16x256xf32> to vector<16x255xf32>
    %cst_21 = arith.constant 0.000000e+00 : f32
    %107 = vector.broadcast %cst_21 : f32 to vector<16x1xf32>
    %108 = tpu.concatenate %106, %107 in 1 : vector<16x255xf32>, vector<16x1xf32> -> vector<16x256xf32>
    %cst_22 = arith.constant 0.000000e+00 : f32
    %109 = vector.shape_cast %60 : vector<1x256xi1> to vector<1x256xi1>
    %110 = vector.broadcast %109 : vector<1x256xi1> to vector<16x256xi1>
    %111 = vector.broadcast %cst_22 : f32 to vector<16x256xf32>
    %112 = arith.select %110, %108, %111 : vector<16x256xi1>, vector<16x256xf32>
    %113 = vector.extract_strided_slice %39 {offsets = [0, 5], sizes = [16, 1], strides = [1, 1]} : vector<16x9xf32> to vector<16x1xf32>
    %114 = vector.broadcast %113 : vector<16x1xf32> to vector<16x256xf32>
    %115 = arith.mulf %114, %112 : vector<16x256xf32>
    %116 = arith.addf %105, %115 : vector<16x256xf32>
    %117 = vector.extract_strided_slice %38 {offsets = [0, 15], sizes = [16, 241], strides = [1, 1]} : vector<16x256xf32> to vector<16x241xf32>
    %cst_23 = arith.constant 0.000000e+00 : f32
    %118 = vector.broadcast %cst_23 : f32 to vector<16x15xf32>
    %119 = tpu.concatenate %117, %118 in 1 : vector<16x241xf32>, vector<16x15xf32> -> vector<16x256xf32>
    %cst_24 = arith.constant 0.000000e+00 : f32
    %120 = vector.shape_cast %58 : vector<1x256xi1> to vector<1x256xi1>
    %121 = vector.broadcast %120 : vector<1x256xi1> to vector<16x256xi1>
    %122 = vector.broadcast %cst_24 : f32 to vector<16x256xf32>
    %123 = arith.select %121, %119, %122 : vector<16x256xi1>, vector<16x256xf32>
    %124 = vector.extract_strided_slice %39 {offsets = [0, 6], sizes = [16, 1], strides = [1, 1]} : vector<16x9xf32> to vector<16x1xf32>
    %125 = vector.broadcast %124 : vector<16x1xf32> to vector<16x256xf32>
    %126 = arith.mulf %125, %123 : vector<16x256xf32>
    %127 = arith.addf %116, %126 : vector<16x256xf32>
    %128 = vector.extract_strided_slice %38 {offsets = [0, 16], sizes = [16, 240], strides = [1, 1]} : vector<16x256xf32> to vector<16x240xf32>
    %cst_25 = arith.constant 0.000000e+00 : f32
    %129 = vector.broadcast %cst_25 : f32 to vector<16x16xf32>
    %130 = tpu.concatenate %128, %129 in 1 : vector<16x240xf32>, vector<16x16xf32> -> vector<16x256xf32>
    %131 = vector.extract_strided_slice %39 {offsets = [0, 7], sizes = [16, 1], strides = [1, 1]} : vector<16x9xf32> to vector<16x1xf32>
    %132 = vector.broadcast %131 : vector<16x1xf32> to vector<16x256xf32>
    %133 = arith.mulf %132, %130 : vector<16x256xf32>
    %134 = arith.addf %127, %133 : vector<16x256xf32>
    %135 = vector.extract_strided_slice %38 {offsets = [0, 17], sizes = [16, 239], strides = [1, 1]} : vector<16x256xf32> to vector<16x239xf32>
    %cst_26 = arith.constant 0.000000e+00 : f32
    %136 = vector.broadcast %cst_26 : f32 to vector<16x17xf32>
    %137 = tpu.concatenate %135, %136 in 1 : vector<16x239xf32>, vector<16x17xf32> -> vector<16x256xf32>
    %cst_27 = arith.constant 0.000000e+00 : f32
    %138 = vector.shape_cast %60 : vector<1x256xi1> to vector<1x256xi1>
    %139 = vector.broadcast %138 : vector<1x256xi1> to vector<16x256xi1>
    %140 = vector.broadcast %cst_27 : f32 to vector<16x256xf32>
    %141 = arith.select %139, %137, %140 : vector<16x256xi1>, vector<16x256xf32>
    %142 = vector.extract_strided_slice %39 {offsets = [0, 8], sizes = [16, 1], strides = [1, 1]} : vector<16x9xf32> to vector<16x1xf32>
    %143 = vector.broadcast %142 : vector<16x1xf32> to vector<16x256xf32>
    %144 = arith.mulf %143, %141 : vector<16x256xf32>
    %145 = arith.addf %134, %144 : vector<16x256xf32>
    %cst_28 = arith.constant 5.000000e-01 : f32
    %146 = vector.broadcast %cst_28 : f32 to vector<16x256xf32>
    %147 = arith.mulf %146, %145 : vector<16x256xf32>
    %148 = arith.mulf %145, %145 : vector<16x256xf32>
    %149 = arith.mulf %148, %145 : vector<16x256xf32>
    %cst_29 = arith.constant 4.471500e-02 : f32
    %150 = vector.broadcast %cst_29 : f32 to vector<16x256xf32>
    %151 = arith.mulf %150, %149 : vector<16x256xf32>
    %152 = arith.addf %145, %151 : vector<16x256xf32>
    %cst_30 = arith.constant 0.797884583 : f32
    %153 = vector.broadcast %cst_30 : f32 to vector<16x256xf32>
    %154 = arith.mulf %153, %152 : vector<16x256xf32>
    %155 = math.tanh %154 : vector<16x256xf32>
    %cst_31 = arith.constant 1.000000e+00 : f32
    %156 = vector.broadcast %cst_31 : f32 to vector<16x256xf32>
    %157 = arith.addf %156, %155 : vector<16x256xf32>
    %158 = arith.mulf %147, %157 : vector<16x256xf32>
    %c0_32 = arith.constant 0 : index
    %c0_33 = arith.constant 0 : index
    %159 = vector.load %arg4[%c0_32, %c0_33] : memref<4x16xf32, #tpu.memory_space<vmem>>, vector<4x16xf32>
    %160 = vector.extract_strided_slice %159 {offsets = [0, 0], sizes = [4, 1], strides = [1, 1]} : vector<4x16xf32> to vector<4x1xf32>
    %161 = vector.extract_strided_slice %158 {offsets = [0, 0], sizes = [1, 256], strides = [1, 1]} : vector<16x256xf32> to vector<1x256xf32>
    %162 = vector.broadcast %160 : vector<4x1xf32> to vector<4x256xf32>
    %163 = vector.broadcast %161 : vector<1x256xf32> to vector<4x256xf32>
    %164 = arith.mulf %162, %163 : vector<4x256xf32>
    %165 = vector.extract_strided_slice %159 {offsets = [0, 1], sizes = [4, 1], strides = [1, 1]} : vector<4x16xf32> to vector<4x1xf32>
    %166 = vector.extract_strided_slice %158 {offsets = [1, 0], sizes = [1, 256], strides = [1, 1]} : vector<16x256xf32> to vector<1x256xf32>
    %167 = vector.broadcast %165 : vector<4x1xf32> to vector<4x256xf32>
    %168 = vector.broadcast %166 : vector<1x256xf32> to vector<4x256xf32>
    %169 = arith.mulf %167, %168 : vector<4x256xf32>
    %170 = arith.addf %164, %169 : vector<4x256xf32>
    %171 = vector.extract_strided_slice %159 {offsets = [0, 2], sizes = [4, 1], strides = [1, 1]} : vector<4x16xf32> to vector<4x1xf32>
    %172 = vector.extract_strided_slice %158 {offsets = [2, 0], sizes = [1, 256], strides = [1, 1]} : vector<16x256xf32> to vector<1x256xf32>
    %173 = vector.broadcast %171 : vector<4x1xf32> to vector<4x256xf32>
    %174 = vector.broadcast %172 : vector<1x256xf32> to vector<4x256xf32>
    %175 = arith.mulf %173, %174 : vector<4x256xf32>
    %176 = arith.addf %170, %175 : vector<4x256xf32>
    %177 = vector.extract_strided_slice %159 {offsets = [0, 3], sizes = [4, 1], strides = [1, 1]} : vector<4x16xf32> to vector<4x1xf32>
    %178 = vector.extract_strided_slice %158 {offsets = [3, 0], sizes = [1, 256], strides = [1, 1]} : vector<16x256xf32> to vector<1x256xf32>
    %179 = vector.broadcast %177 : vector<4x1xf32> to vector<4x256xf32>
    %180 = vector.broadcast %178 : vector<1x256xf32> to vector<4x256xf32>
    %181 = arith.mulf %179, %180 : vector<4x256xf32>
    %182 = arith.addf %176, %181 : vector<4x256xf32>
    %183 = vector.extract_strided_slice %159 {offsets = [0, 4], sizes = [4, 1], strides = [1, 1]} : vector<4x16xf32> to vector<4x1xf32>
    %184 = vector.extract_strided_slice %158 {offsets = [4, 0], sizes = [1, 256], strides = [1, 1]} : vector<16x256xf32> to vector<1x256xf32>
    %185 = vector.broadcast %183 : vector<4x1xf32> to vector<4x256xf32>
    %186 = vector.broadcast %184 : vector<1x256xf32> to vector<4x256xf32>
    %187 = arith.mulf %185, %186 : vector<4x256xf32>
    %188 = arith.addf %182, %187 : vector<4x256xf32>
    %189 = vector.extract_strided_slice %159 {offsets = [0, 5], sizes = [4, 1], strides = [1, 1]} : vector<4x16xf32> to vector<4x1xf32>
    %190 = vector.extract_strided_slice %158 {offsets = [5, 0], sizes = [1, 256], strides = [1, 1]} : vector<16x256xf32> to vector<1x256xf32>
    %191 = vector.broadcast %189 : vector<4x1xf32> to vector<4x256xf32>
    %192 = vector.broadcast %190 : vector<1x256xf32> to vector<4x256xf32>
    %193 = arith.mulf %191, %192 : vector<4x256xf32>
    %194 = arith.addf %188, %193 : vector<4x256xf32>
    %195 = vector.extract_strided_slice %159 {offsets = [0, 6], sizes = [4, 1], strides = [1, 1]} : vector<4x16xf32> to vector<4x1xf32>
    %196 = vector.extract_strided_slice %158 {offsets = [6, 0], sizes = [1, 256], strides = [1, 1]} : vector<16x256xf32> to vector<1x256xf32>
    %197 = vector.broadcast %195 : vector<4x1xf32> to vector<4x256xf32>
    %198 = vector.broadcast %196 : vector<1x256xf32> to vector<4x256xf32>
    %199 = arith.mulf %197, %198 : vector<4x256xf32>
    %200 = arith.addf %194, %199 : vector<4x256xf32>
    %201 = vector.extract_strided_slice %159 {offsets = [0, 7], sizes = [4, 1], strides = [1, 1]} : vector<4x16xf32> to vector<4x1xf32>
    %202 = vector.extract_strided_slice %158 {offsets = [7, 0], sizes = [1, 256], strides = [1, 1]} : vector<16x256xf32> to vector<1x256xf32>
    %203 = vector.broadcast %201 : vector<4x1xf32> to vector<4x256xf32>
    %204 = vector.broadcast %202 : vector<1x256xf32> to vector<4x256xf32>
    %205 = arith.mulf %203, %204 : vector<4x256xf32>
    %206 = arith.addf %200, %205 : vector<4x256xf32>
    %207 = vector.extract_strided_slice %159 {offsets = [0, 8], sizes = [4, 1], strides = [1, 1]} : vector<4x16xf32> to vector<4x1xf32>
    %208 = vector.extract_strided_slice %158 {offsets = [8, 0], sizes = [1, 256], strides = [1, 1]} : vector<16x256xf32> to vector<1x256xf32>
    %209 = vector.broadcast %207 : vector<4x1xf32> to vector<4x256xf32>
    %210 = vector.broadcast %208 : vector<1x256xf32> to vector<4x256xf32>
    %211 = arith.mulf %209, %210 : vector<4x256xf32>
    %212 = arith.addf %206, %211 : vector<4x256xf32>
    %213 = vector.extract_strided_slice %159 {offsets = [0, 9], sizes = [4, 1], strides = [1, 1]} : vector<4x16xf32> to vector<4x1xf32>
    %214 = vector.extract_strided_slice %158 {offsets = [9, 0], sizes = [1, 256], strides = [1, 1]} : vector<16x256xf32> to vector<1x256xf32>
    %215 = vector.broadcast %213 : vector<4x1xf32> to vector<4x256xf32>
    %216 = vector.broadcast %214 : vector<1x256xf32> to vector<4x256xf32>
    %217 = arith.mulf %215, %216 : vector<4x256xf32>
    %218 = arith.addf %212, %217 : vector<4x256xf32>
    %219 = vector.extract_strided_slice %159 {offsets = [0, 10], sizes = [4, 1], strides = [1, 1]} : vector<4x16xf32> to vector<4x1xf32>
    %220 = vector.extract_strided_slice %158 {offsets = [10, 0], sizes = [1, 256], strides = [1, 1]} : vector<16x256xf32> to vector<1x256xf32>
    %221 = vector.broadcast %219 : vector<4x1xf32> to vector<4x256xf32>
    %222 = vector.broadcast %220 : vector<1x256xf32> to vector<4x256xf32>
    %223 = arith.mulf %221, %222 : vector<4x256xf32>
    %224 = arith.addf %218, %223 : vector<4x256xf32>
    %225 = vector.extract_strided_slice %159 {offsets = [0, 11], sizes = [4, 1], strides = [1, 1]} : vector<4x16xf32> to vector<4x1xf32>
    %226 = vector.extract_strided_slice %158 {offsets = [11, 0], sizes = [1, 256], strides = [1, 1]} : vector<16x256xf32> to vector<1x256xf32>
    %227 = vector.broadcast %225 : vector<4x1xf32> to vector<4x256xf32>
    %228 = vector.broadcast %226 : vector<1x256xf32> to vector<4x256xf32>
    %229 = arith.mulf %227, %228 : vector<4x256xf32>
    %230 = arith.addf %224, %229 : vector<4x256xf32>
    %231 = vector.extract_strided_slice %159 {offsets = [0, 12], sizes = [4, 1], strides = [1, 1]} : vector<4x16xf32> to vector<4x1xf32>
    %232 = vector.extract_strided_slice %158 {offsets = [12, 0], sizes = [1, 256], strides = [1, 1]} : vector<16x256xf32> to vector<1x256xf32>
    %233 = vector.broadcast %231 : vector<4x1xf32> to vector<4x256xf32>
    %234 = vector.broadcast %232 : vector<1x256xf32> to vector<4x256xf32>
    %235 = arith.mulf %233, %234 : vector<4x256xf32>
    %236 = arith.addf %230, %235 : vector<4x256xf32>
    %237 = vector.extract_strided_slice %159 {offsets = [0, 13], sizes = [4, 1], strides = [1, 1]} : vector<4x16xf32> to vector<4x1xf32>
    %238 = vector.extract_strided_slice %158 {offsets = [13, 0], sizes = [1, 256], strides = [1, 1]} : vector<16x256xf32> to vector<1x256xf32>
    %239 = vector.broadcast %237 : vector<4x1xf32> to vector<4x256xf32>
    %240 = vector.broadcast %238 : vector<1x256xf32> to vector<4x256xf32>
    %241 = arith.mulf %239, %240 : vector<4x256xf32>
    %242 = arith.addf %236, %241 : vector<4x256xf32>
    %243 = vector.extract_strided_slice %159 {offsets = [0, 14], sizes = [4, 1], strides = [1, 1]} : vector<4x16xf32> to vector<4x1xf32>
    %244 = vector.extract_strided_slice %158 {offsets = [14, 0], sizes = [1, 256], strides = [1, 1]} : vector<16x256xf32> to vector<1x256xf32>
    %245 = vector.broadcast %243 : vector<4x1xf32> to vector<4x256xf32>
    %246 = vector.broadcast %244 : vector<1x256xf32> to vector<4x256xf32>
    %247 = arith.mulf %245, %246 : vector<4x256xf32>
    %248 = arith.addf %242, %247 : vector<4x256xf32>
    %249 = vector.extract_strided_slice %159 {offsets = [0, 15], sizes = [4, 1], strides = [1, 1]} : vector<4x16xf32> to vector<4x1xf32>
    %250 = vector.extract_strided_slice %158 {offsets = [15, 0], sizes = [1, 256], strides = [1, 1]} : vector<16x256xf32> to vector<1x256xf32>
    %251 = vector.broadcast %249 : vector<4x1xf32> to vector<4x256xf32>
    %252 = vector.broadcast %250 : vector<1x256xf32> to vector<4x256xf32>
    %253 = arith.mulf %251, %252 : vector<4x256xf32>
    %254 = arith.addf %248, %253 : vector<4x256xf32>
    %c0_34 = arith.constant 0 : index
    %c0_35 = arith.constant 0 : index
    %c0_36 = arith.constant 0 : index
    %255 = vector.load %arg5[%c0_34, %c0_35, %c0_36] : memref<1x4x256xf32, #tpu.memory_space<vmem>>, vector<1x4x256xf32>
    %256 = vector.shape_cast %255 : vector<1x4x256xf32> to vector<4x256xf32>
    %257 = vector.shape_cast %254 : vector<4x256xf32> to vector<1x4x256xf32>
    tpu.vector_store %arg5[%c0_34, %c0_35, %c0_36], %257 {strides = array<i32>} : memref<1x4x256xf32, #tpu.memory_space<vmem>>, vector<1x4x256xf32>,
    return
  }
  func.func @transform_0(%arg0: i32) -> (i32, i32, i32) {
    %c0_i32 = arith.constant 0 : i32
    %c0_i32_0 = arith.constant 0 : i32
    %c0_i32_1 = arith.constant 0 : i32
    return %arg0, %c0_i32, %c0_i32_0 : i32, i32, i32
  }
  func.func @transform_1(%arg0: i32) -> (i32, i32) {
    %c0_i32 = arith.constant 0 : i32
    %c0_i32_0 = arith.constant 0 : i32
    %c0_i32_1 = arith.constant 0 : i32
    return %c0_i32, %c0_i32_0 : i32, i32
  }
  func.func @transform_2(%arg0: i32) -> (i32, i32) {
    %c0_i32 = arith.constant 0 : i32
    %c0_i32_0 = arith.constant 0 : i32
    %c0_i32_1 = arith.constant 0 : i32
    return %c0_i32, %c0_i32_0 : i32, i32
  }
  func.func @transform_3(%arg0: i32) -> (i32, i32) {
    %c0_i32 = arith.constant 0 : i32
    %c0_i32_0 = arith.constant 0 : i32
    %c0_i32_1 = arith.constant 0 : i32
    return %c0_i32, %c0_i32_0 : i32, i32
  }
  func.func @transform_4(%arg0: i32) -> (i32, i32, i32) {
    %c0_i32 = arith.constant 0 : i32
    %c0_i32_0 = arith.constant 0 : i32
    %c0_i32_1 = arith.constant 0 : i32
    return %arg0, %c0_i32, %c0_i32_0 : i32, i32, i32
  }
}

</mosaic_0001>

<bundles_post_ra>
// kernel: tpu_custom_call.1
= control target key start
LH: loop header
LB: loop body
LE: loop exit
PB: predicated region body
PF: predicated region fallthrough
CT: control target
= control target key end

     0   :  { %9 = vsyncpa [#allocation3], 0  ;;  %s1752_s0 = inlined_call_operand.vmem [shape: f32[2,4,256], index: 0, kind: input, shape index: {}]   ;;  %s1753_s1 = inlined_call_operand.vmem [shape: f32[16,4], index: 1, kind: input, shape index: {}]   ;;  %s1754_s2 = inlined_call_operand.hbm [shape: f32[16,9], index: 2, kind: input, shape index: {}]   ;;  %s1755_s3 = inlined_call_operand.vmem [shape: f32[4,16], index: 3, kind: input, shape index: {}]   ;;  %s1756_s4 = inlined_call_operand.hbm [shape: f32[2,4,256], index: 4, kind: output, shape index: {}]  }
   0x1   :  { %10 = vsyncpa [#allocation4], 0 }
   0x2   :  { %12 = vsyncpa [#allocation4 + $0x1], 0  ;;  %s1277_s15 = smov 0   ;;  %s1279_s16 = smov 0  }
   0x3   :  { %s1281_s17 = smov 0   ;;  %s1283_s18 = smov 0  }
   0x4 LB: > { %s1298_s19 = sadd.s32 4294967295, %s1223_s18   ;;  %s981_s20 = sadd.s32 4294967294, %s1223_s18   ;;  %s1223_s18 = sphi %s1283_s18, %s1770_s18   ;;  %s1219_s17 = sphi %s1281_s17, %s1769_s17   ;;  %s1215_s16 = sphi %s1279_s16, %s1768_s16   ;;  %s1211_s15 = sphi %s1277_s15, %s1767_s15  }
   0x5   : > { %s1302_s21 = sadd.s32 1, %s1223_s18   ;;  %s114_s22 = sadd.s32 1, %s1219_s17 }
   0x6   : > { %s111_s23 = ssub.s32 %s1223_s18, %s1302_s21  ;;  %p124_p0 = scmp.ne.s32.totalorder %s1219_s17, %s1215_s16 }
   0x7   : > { %p112_p1 = scmp.eq.s32.totalorder %s111_s23, 0  ;;  %p125_p2 = scmp.eq.s32.totalorder %s1298_s19, 1 }
   0x8   : > { %p130_p3 = scmp.ne.s32.totalorder %s1215_s16, %s1211_s15  ;;  %p131_p4 = scmp.eq.s32.totalorder %s981_s20, 1 }
   0x9   : > { %s1313_s24 = scalar_select %p112_p1, %s1219_s17, %s114_s22  }
   0xa   : > { %p1315_p5 = por %p125_p2, %p124_p0  ;;  %p1319_p6 = por %p131_p4, %p130_p3 }
   0xb   : > { %p982_p7 = scmp.ge.s32.totalorder %s1223_s18, 1  ;;  %p138_p8 = scmp.lt.s32.totalorder %s1223_s18, 3 }
   0xc   : > { %p1011_p9 = scmp.eq.s32.totalorder %s1298_s19, 0  ;;  %s152_s29 = sshll.u32 %s1754_s2, 4  ;;  %s153_s29 = int_to_ptr.hbm [resolvable:$true] %s152_s29 }
   0xd   : > { %p139_p10 = pnand %p982_p7, %p138_p8  ;;  %s1225_s30 = smov [#allocation2]  }
   0xe   : > { %s154_s5 = sshll.u32 %s1225_s30, 4  ;;  %s1226_s6 = smov 128   ;;  %s155_s5 = int_to_ptr.vmem [resolvable:$true] %s154_s5 }
   0xf   : > { %p1003_p11 = pneg %p139_p10  ;;  %s1227_s7 = smov 8  }
  0x10   : > { %181 = sbr.rel (%p139_p10) target bundleno = 471 (0x1d7), region = 36 }
  0x11   : > { %p1004_p12 = pnand %p1011_p9, %p1003_p11 }
  0x13   : > { %1006 = dma.hbm_to_vmem [thread:$0]  (!%p1004_p12), %s153_s29, 256, %s155_s5, [#allocation3], %s1226_s6, %s1226_s6, %s1227_s7  }
  0x15   : > { %1202 = dma.done.wait (%p1011_p9), [#allocation3], 256  }
  0x16   : > { %1204 = vsyncadd (%p1011_p9), [#allocation3], 4294967040  ;;  %v1228_v0 = vmov 3   ;;  %v1229_v1 = vmov 1   ;;  %v214_v2 = vld [vmem:[%s1753_s1] sm:$0xff]  ;;  %v1230_v3 = vmov 2  }
  0x17   : > { %1075 = vset.pattern.permute.xlu0 %v1228_v0  ;;  %1073 = vset.pattern.permute.xlu1 %v1229_v1  ;;  %v215_v4 = vld [vmem:[%s1753_s1 + $0x8] sm:$0xff]  ;;  %v1344_v5 = vld [vmem:[#allocation2] sm:$0xff]  ;;  %v1231_v6 = vmov 4   ;;  %v1232_v7 = vmov 0   ;;  %v1233_v9 = vmov 5   ;;  %p208_p13 = scmp.lt.s32.totalorder %s1298_s19, 1 }
  0x18   : > { %282 = vperm.xlu0 %1075, %v214_v2   ;;  %238 = vperm.xlu1 %1073, %v214_v2   ;;  %v1350_v8 = vld [vmem:[#allocation2 + $0x8] sm:$0xff]  ;;  %v1234_v11 = vmov 6   ;;  %v1235_v15 = vmov 7   ;;  %s1236_s23 = smov 17   ;;  %s1237_s27 = smov 16   ;;  %vm460_vm0 = vcmask 121856  }
  0x19   : > { %1074 = vset.pattern.permute.xlu2 %v1230_v3  ;;  %s209_s12 = scalar_select %p208_p13, %s1298_s19, 1  ;;  %vm427_vm1 = vcmask 130048   ;;  %vm384_vm2 = vcmask 138240   ;;  %vm501_vm5 = vcmask 7168   ;;  %vm554_vm8 = vcmask 1039360  }
  0x1a   : > { %260 = vperm.xlu2 %1074, %v214_v2   ;;  %s1238_s28 = smov 15   ;;  %s1239_s29 = smov 1   ;;  %vm591_vm9 = vcmask 924672   ;;  %vm661_vm10 = vcmask 908288   ;;  %vm628_vm11 = vcmask 916480   ;;  %vm889_vm12 = vcmask 1043456  }
  0x1b   : > { %s995_s13 = sshll.u32 %s209_s12, 3  ;;  %s1241_s30 = smov 127  }
  0x1c   : > { %s212_s22 = scalar_lea.vmem %s1752_s0, %s995_s13  ;;  %s1242_s5 = smov 113  }
  0x1d   : > { %v213_v12 = vld [vmem:[%s212_s22] sm:$0xff]  ;;  %s1243_s6 = smov 112   ;;  %s1244_s7 = smov 111  }
  0x1e   : > { %v267_v16 = vperm.slane %v213_v12, 2  ;;  %v268_v17 = vperm.slane %v213_v12, 6  ;;  %v245_v18 = vperm.slane %v213_v12, 1  ;;  %v246_v19 = vperm.slane %v213_v12, 5  ;;  %s205_s10 = sand.u32 1, %s1215_s16   ;;  %s996_s12 = sshll.u32 %s1298_s19, 3 }
  0x1f   : > { %v227_v20 = vperm.slane %v213_v12, 0  ;;  %v228_v21 = vperm.slane %v213_v12, 4  ;;  %v289_v22 = vperm.slane %v213_v12, 3  ;;  %v290_v23 = vperm.slane %v213_v12, 7  ;;  %s987_s11 = sshll.u32 %s205_s10, 3  ;;  %s905_s20 = scalar_lea.hbm %s1756_s4, %s996_s12 }
  0x20   : > { %1085 = vset.pattern.permute.xlu0 %v1231_v6  ;;  %242 = vperm.xlu1 %1073, %v215_v4   ;;  %v271_v24 = vperm.slane %v267_v16, 2  ;;  %v272_v25 = vperm.slane %v268_v17, 2  ;;  %v249_v26 = vperm.slane %v245_v18, 1  ;;  %v250_v27 = vperm.slane %v246_v19, 1  ;;  %s207_s22 = scalar_lea.vmem [#allocation5], %s987_s11  ;;  %s909_s19 = sshll.u32 %s905_s20, 4  ;;  %s910_s19 = int_to_ptr.hbm [resolvable:$true] %s909_s19 }
  0x21   : > { %531 = vperm.xlu0 %1085, %v1344_v5   ;;  %v231_v28 = vperm.slane %v227_v20, 0  ;;  %v232_v29 = vperm.slane %v228_v21, 0  ;;  %v293_v31 = vperm.slane %v289_v22, 3  ;;  %v294_v32 = vperm.slane %v290_v23, 3 }
  0x22   : > { %264 = vperm.xlu2 %1074, %v215_v4  }
  0x28   : > { %1076 = vset.pattern.permute.xlu1 %v1228_v0 }
  0x29   : > { %1086 = vset.pattern.permute.xlu0 %v1232_v7  ;;  %286 = vperm.xlu1 %1076, %v215_v4  }
  0x2a   : > { %218 = vperm.xlu0 %1086, %v214_v2   ;;  %1078 = vset.pattern.permute.xlu2 %v1232_v7 }
  0x2b   : > { %408 = vperm.xlu2 %1078, %v1350_v8  }
  0x31   : > { %1077 = vset.pattern.permute.xlu1 %v1232_v7 }
  0x32   : > { %223 = vperm.xlu0 %1086, %v215_v4   ;;  %403 = vperm.xlu1 %1077, %v1344_v5  }
  0x33   : > { %1080 = vset.pattern.permute.xlu2 %v1229_v1 }
  0x34   : > { %441 = vperm.xlu2 %1080, %v1350_v8  }
  0x3a   : > { %1079 = vset.pattern.permute.xlu1 %v1229_v1 }
  0x3b   : > { %437 = vperm.xlu1 %1079, %v1344_v5  }
  0x3c   : > { %1082 = vset.pattern.permute.xlu2 %v1230_v3 }
  0x3d   : > { %482 = vperm.xlu2 %1082, %v1350_v8  }
  0x43   : > { %1081 = vset.pattern.permute.xlu1 %v1230_v3 }
  0x44   : > { %478 = vperm.xlu1 %1081, %v1344_v5  }
  0x45   : > { %1084 = vset.pattern.permute.xlu2 %v1228_v0 }
  0x46   : > { %519 = vperm.xlu2 %1084, %v1350_v8  }
  0x4c   : > { %1083 = vset.pattern.permute.xlu1 %v1228_v0 }
  0x4d   : > { %515 = vperm.xlu1 %1083, %v1344_v5  }
  0x4e   : > { %1089 = vset.pattern.permute.xlu2 %v1233_v9 }
  0x4f   : > { %572 = vperm.xlu2 %1089, %v1350_v8  }
  0x55   : > { %1087 = vset.pattern.permute.xlu1 %v1231_v6 }
  0x56   : > { %535 = vperm.xlu1 %1087, %v1350_v8  }
  0x57   : > { %1091 = vset.pattern.permute.xlu2 %v1234_v11 }
  0x58   : > { %609 = vperm.xlu2 %1091, %v1350_v8  }
  0x5e   : > { %1088 = vset.pattern.permute.xlu1 %v1233_v9 }
  0x5f   : > { %568 = vperm.xlu1 %1088, %v1344_v5  }
  0x60   : > { %1093 = vset.pattern.permute.xlu2 %v1235_v15 }
  0x61   : > { %642 = vperm.xlu2 %1093, %v1350_v8  }
  0x67   : > { %1090 = vset.pattern.permute.xlu1 %v1234_v11 }
  0x68   : > { %605 = vperm.xlu1 %1090, %v1344_v5  }
  0x70   : > { %1092 = vset.pattern.permute.xlu1 %v1235_v15 }
  0x71   : > { %638 = vperm.xlu1 %1092, %v1344_v5  }
  0x74   : > { %v261_v30 = vpop.permute.xlu2 %260 }
  0x75   : > { %v273_v33 = vmul.f32 %v271_v24, %v261_v30  ;;  %v274_v34 = vmul.f32 %v272_v25, %v261_v30 }
  0x7c   : > { %v265_v49 = vpop.permute.xlu2 %264 }
  0x7d   : > { %v275_v59 = vmul.f32 %v271_v24, %v265_v49  ;;  %v276_v60 = vmul.f32 %v272_v25, %v265_v49 }
  0x85   : > { %v1400_v49 = vpop.permute.xlu2 %408 }
  0x8a   : > { %v283_v10 = vpop.permute.xlu0 %282  ;;  %v239_v13 = vpop.permute.xlu1 %238 }
  0x8b   : > { %v251_v36 = vmul.f32 %v249_v26, %v239_v13  ;;  %v252_v37 = vmul.f32 %v250_v27, %v239_v13  ;;  %v295_v43 = vmul.f32 %v293_v31, %v283_v10  ;;  %v296_v44 = vmul.f32 %v294_v32, %v283_v10 }
  0x92   : > { %v243_v38 = vpop.permute.xlu1 %242 }
  0x93   : > { %v1380_v14 = vpop.permute.xlu0 %531  ;;  %v253_v53 = vmul.f32 %v249_v26, %v243_v38  ;;  %v254_v54 = vmul.f32 %v250_v27, %v243_v38 }
  0x9b   : > { %v287_v61 = vpop.permute.xlu1 %286 }
  0x9c   : > { %v219_v35 = vpop.permute.xlu0 %218  ;;  %v297_v62 = vmul.f32 %v293_v31, %v287_v61  ;;  %v298_v63 = vmul.f32 %v294_v32, %v287_v61 }
  0x9d   : > { %v233_v39 = vmul.f32 %v231_v28, %v219_v35  ;;  %v234_v40 = vmul.f32 %v232_v29, %v219_v35 }
  0x9f   : > { %v255_v41 = vadd.f32 %v251_v36, %v233_v39  ;;  %v256_v42 = vadd.f32 %v252_v37, %v234_v40 }
  0xa1   : > { %v277_v45 = vadd.f32 %v273_v33, %v255_v41  ;;  %v278_v46 = vadd.f32 %v274_v34, %v256_v42 }
  0xa3   : > { %v299_v47 = vadd.f32 %v295_v43, %v277_v45  ;;  %v300_v48 = vadd.f32 %v296_v44, %v278_v46 }
  0xa4   : > { %v224_v50 = vpop.permute.xlu0 %223 }
  0xa5   : > { %v307_v51 = vmul.f32 %v299_v47, %v299_v47  ;;  %v308_v52 = vmul.f32 %v300_v48, %v300_v48  ;;  %v235_v55 = vmul.f32 %v231_v28, %v224_v50  ;;  %v236_v56 = vmul.f32 %v232_v29, %v224_v50 }
  0xa6   : > { %v303_v32 = vmul.f32 0.5, %v299_v47  ;;  %v304_v36 = vmul.f32 0.5, %v300_v48  ;;  %v1240_v50 = vmov 8  }
  0xa7   : > { %v311_v57 = vmul.f32 %v307_v51, %v299_v47  ;;  %v312_v58 = vmul.f32 %v308_v52, %v300_v48  ;;  %v257_v2 = vadd.f32 %v253_v53, %v235_v55  ;;  %v258_v4 = vadd.f32 %v254_v54, %v236_v56  ;;  %1094 = vset.pattern.permute.xlu1 %v1240_v50  ;;  %v1404_v51 = vpop.permute.xlu2 %441  ;;  %v1408_v52 = vpop.permute.xlu1 %403 }
  0xa8   : > { %1095 = vset.pattern.permute.xlu2 %v1240_v50 }
  0xa9   : > { %v315_v7 = vmul.f32 0.044715, %v311_v57  ;;  %v316_v10 = vmul.f32 0.044715, %v312_v58  ;;  %v279_v12 = vadd.f32 %v275_v59, %v257_v2  ;;  %v280_v13 = vadd.f32 %v276_v60, %v258_v4  ;;  %v1439_v60 = vld [vmem:[%s1755_s3] sm:$0xf] }
  0xab   : > { %v319_v16 = vadd.f32 %v315_v7, %v299_v47  ;;  %v320_v17 = vadd.f32 %v316_v10, %v300_v48  ;;  %v301_v18 = vadd.f32 %v297_v62, %v279_v12  ;;  %v302_v19 = vadd.f32 %v298_v63, %v280_v13 }
  0xac   : > { %v341_v63 = vlaneseq }
  0xad   : > { %v323_v20 = vmul.f32 0.7978846, %v319_v16  ;;  %v324_v21 = vmul.f32 0.7978846, %v320_v17  ;;  %v309_v22 = vmul.f32 %v301_v18, %v301_v18  ;;  %v310_v23 = vmul.f32 %v302_v19, %v302_v19 }
  0xae   : > { %v305_v43 = vmul.f32 0.5, %v301_v18  ;;  %v306_v45 = vmul.f32 0.5, %v302_v19  ;;  %v342_v2 = vand.u32 127, %v341_v63  ;;  %v1246_v16 = vmov 9  }
  0xaf   : > { %1111 = vtanh.f32 %v323_v20  ;;  %v313_v24 = vmul.f32 %v309_v22, %v301_v18  ;;  %v314_v25 = vmul.f32 %v310_v23, %v302_v19  ;;  %v1410_v53 = vpop.permute.xlu2 %482  ;;  %v1414_v54 = vpop.permute.xlu1 %437 }
  0xb0   : > { %1113 = vtanh.f32 %v324_v21  ;;  %v348_v4 = vand.u32 15, %v342_v2 }
  0xb1   : > { %v317_v26 = vmul.f32 0.044715, %v313_v24  ;;  %v318_v27 = vmul.f32 0.044715, %v314_v25 }
  0xb2   : > { %vm1487_vm3 = vcmp.ne.s32.totalorder %v348_v4, 15  ;;  %vm1496_vm4 = vcmp.ne.s32.totalorder %v348_v4, 0 }
  0xb3   : > { %v321_v28 = vadd.f32 %v317_v26, %v301_v18  ;;  %v322_v29 = vadd.f32 %v318_v27, %v302_v19  ;;  %v1247_v19 = vmov 13  }
  0xb5   : > { %v1112_v30 = vpop.eup %1111  ;;  %v325_v34 = vmul.f32 0.7978846, %v321_v28  ;;  %v326_v35 = vmul.f32 0.7978846, %v322_v29 }
  0xb6   : > { %v1114_v31 = vpop.eup %1113  ;;  %v331_v33 = vadd.f32 1.0, %v1112_v30 }
  0xb7   : > { %v332_v37 = vadd.f32 1.0, %v1114_v31  ;;  %1115 = vtanh.f32 %v325_v34  ;;  %v1419_v55 = vpop.permute.xlu2 %519  ;;  %v1421_v56 = vpop.permute.xlu1 %478 }
  0xb8   : > { %v1386_v38 = vmul.f32 %v331_v33, %v303_v32  ;;  %1117 = vtanh.f32 %v326_v35  ;;  %v1248_v32 = vmov 12  }
  0xb9   : > { %v336_v39 = vmul.f32 %v332_v37, %v304_v36  ;;  %v343_v37 = vadd.s32 128, %v342_v2 }
  0xba   : > { %376 = vrot.lane.b32.xlu2 %v1386_v38, %s1236_s23 }
  0xbb   : > { %378 = vrot.lane.b32.xlu1 %v336_v39, %s1236_s23  ;;  %v1390_v40 = vmul.f32 %v1380_v14, %v336_v39 }
  0xbd   : > { %v1116_v41 = vpop.eup %1115 }
  0xbe   : > { %v1118_v42 = vpop.eup %1117  ;;  %v333_v44 = vadd.f32 1.0, %v1116_v41 }
  0xbf   : > { %v334_v46 = vadd.f32 1.0, %v1118_v42  ;;  %v1426_v57 = vpop.permute.xlu2 %572  ;;  %v1432_v58 = vpop.permute.xlu1 %515 }
  0xc0   : > { %v1392_v47 = vmul.f32 %v333_v44, %v305_v43  ;;  %v355_v43 = vand.u32 15, %v343_v37  ;;  %v1249_v44 = vmov 14  }
  0xc1   : > { %v1394_v48 = vmul.f32 %v334_v46, %v306_v45 }
  0xc2   : > { %380 = vrot.lane.b32.xlu2 %v1392_v47, %s1236_s23  ;;  %vm1525_vm6 = vcmp.ne.s32.totalorder %v355_v43, 0  ;;  %vm1543_vm7 = vcmp.ne.s32.totalorder %v355_v43, 15 }
  0xc3   : > { %421 = vrot.lane.b32.xlu1 %v336_v39, %s1237_s27  ;;  %382 = vrot.lane.b32.xlu0 %v1394_v48, %s1236_s23  ;;  %s907_s23 = sshll.u32 %s207_s22, 4  ;;  %s908_s23 = int_to_ptr.vmem [resolvable:$true] %s907_s23 }
  0xc7   : > { %v1434_v59 = vpop.permute.xlu2 %609 }
  0xca   : > { %423 = vrot.lane.b32.xlu2 %v1392_v47, %s1237_s27 }
  0xcb   : > { %454 = vrot.lane.b32.xlu1 %v336_v39, %s1238_s28  ;;  %419 = vrot.lane.b32.xlu0 %v1386_v38, %s1237_s27 }
  0xcf   : > { %v1447_v61 = vpop.permute.xlu2 %642 }
  0xd2   : > { %456 = vrot.lane.b32.xlu2 %v1392_v47, %s1238_s28 }
  0xd3   : > { %495 = vrot.lane.b32.xlu1 %v336_v39, %s1239_s29  ;;  %425 = vrot.lane.b32.xlu0 %v1394_v48, %s1237_s27  ;;  %s894_s27 = scalar_lea.sflag [#allocation4], %s205_s10 }
  0xda   : > { %497 = vrot.lane.b32.xlu2 %v1392_v47, %s1239_s29 }
  0xdb   : > { %548 = vrot.lane.b32.xlu1 %v336_v39, %s1241_s30  ;;  %452 = vrot.lane.b32.xlu0 %v1386_v38, %s1238_s28 }
  0xe2   : > { %546 = vrot.lane.b32.xlu2 %v1386_v38, %s1241_s30 }
  0xe3   : > { %585 = vrot.lane.b32.xlu1 %v336_v39, %s1242_s5  ;;  %458 = vrot.lane.b32.xlu0 %v1394_v48, %s1238_s28  ;;  %s1171_s28 = sshra.s32 %s910_s19, 4  ;;  %s1172_s28 = int_to_ptr.hbm [resolvable:$true] %s1171_s28 }
  0xe4   : > { %p1178_p3 = scmp.lt.s32.totalorder %s1172_s28, %s1756_s4 }
  0xea   : > { %550 = vrot.lane.b32.xlu2 %v1392_v47, %s1241_s30 }
  0xeb   : > { %622 = vrot.lane.b32.xlu1 %v336_v39, %s1243_s6  ;;  %493 = vrot.lane.b32.xlu0 %v1386_v38, %s1239_s29 }
  0xf2   : > { %587 = vrot.lane.b32.xlu2 %v1392_v47, %s1242_s5 }
  0xf3   : > { %655 = vrot.lane.b32.xlu1 %v336_v39, %s1244_s7  ;;  %499 = vrot.lane.b32.xlu0 %v1394_v48, %s1239_s29  ;;  %s1173_s29 = scalar_lea.hbm %s1172_s28, 8 }
  0xf4   : > { %p1174_p0 = scmp.ne.s32.totalorder %s1172_s28, %s1173_s29 }
  0xf6   : > { %p1175_p1 = pnand %p1174_p0, %p1315_p5 }
  0xf8   : > { %p1176_p2 = pneg %p1175_p1 }
  0xfa   : > { %624 = vrot.lane.b32.xlu2 %v1392_v47, %s1243_s6 }
  0xfb   : > { %675 = vperm.xlu1 %1094, %v1344_v5   ;;  %552 = vrot.lane.b32.xlu0 %v1394_v48, %s1241_s30  ;;  %v1445_v5 = vpop.permute.xlu1 %535 }
  0xfc   : > { %v540_v35 = vmul.f32 %v1445_v5, %v1392_v47 }
 0x102   : > { %679 = vperm.xlu2 %1095, %v1350_v8  }
 0x103   : > { %1096 = vset.pattern.permute.xlu1 %v1229_v1  ;;  %583 = vrot.lane.b32.xlu0 %v1386_v38, %s1242_s5  ;;  %v1455_v1 = vpop.permute.xlu1 %568 }
 0x104   : > { %737 = vperm.xlu1 %1096, %v1439_v60  }
 0x10a   : > { %657 = vrot.lane.b32.xlu2 %v1392_v47, %s1244_s7  ;;  %v1250_v47 = vmov 10  }
 0x10b   : > { %589 = vrot.lane.b32.xlu0 %v1394_v48, %s1242_s5  ;;  %1097 = vset.pattern.permute.xlu2 %v1230_v3  ;;  %v1464_v62 = vpop.permute.xlu1 %605 }
 0x10c   : > { %1098 = vset.pattern.permute.xlu1 %v1228_v0 }
 0x10d   : > { %757 = vperm.xlu1 %1098, %v1439_v60  }
 0x112   : > { %747 = vperm.xlu2 %1097, %v1439_v60  }
 0x113   : > { %620 = vrot.lane.b32.xlu0 %v1386_v38, %s1243_s6  ;;  %v1471_v3 = vpop.permute.xlu1 %638 }
 0x114   : > { %v1460_v8 = vpop.permute.xlu2 %376 }
 0x115   : > { %1101 = vset.pattern.permute.xlu1 %v1234_v11 }
 0x116   : > { %787 = vperm.xlu1 %1101, %v1439_v60  }
 0x11a   : > { %1099 = vset.pattern.permute.xlu2 %v1231_v6  ;;  %v1245_v6 = vmov 11  }
 0x11b   : > { %626 = vrot.lane.b32.xlu0 %v1394_v48, %s1243_s6  ;;  %767 = vperm.xlu2 %1099, %v1439_v60   ;;  %s1177_s6 = scalar_lea.hbm %s1756_s4, 16 }
 0x11c   : > { %v381_v0 = vpop.permute.xlu2 %380  ;;  %p1179_p4 = scmp.lt.s32.totalorder %s1177_s6, %s1173_s29 }
 0x11e   : > { %1103 = vset.pattern.permute.xlu1 %v1240_v50  ;;  %p1180_p7 = por %p1179_p4, %p1178_p3 }
 0x11f   : > { %807 = vperm.xlu1 %1103, %v1439_v60  }
 0x120   : > { %p1181_p8 = pnand %p1180_p7, %p1176_p2 }
 0x123   : > { %653 = vrot.lane.b32.xlu0 %v1386_v38, %s1244_s7  ;;  %1102 = vset.pattern.permute.xlu2 %v1235_v15  ;;  %v392_v15 = vsel %vm384_vm2, 0.0, %v381_v0 }
 0x124   : > { %v1476_v11 = vpop.permute.xlu2 %423  ;;  %797 = vperm.xlu2 %1102, %v1439_v60   ;;  %v399_v20 = vsel %vm1496_vm4, %v392_v15, 0.0  ;;  %v1251_v15 = vmov 15  }
 0x125   : > { %v435_v17 = vsel %vm427_vm1, 0.0, %v1476_v11  ;;  %v413_v23 = vmul.f32 %v1400_v49, %v399_v20 }
 0x126   : > { %v446_v22 = vmul.f32 %v1404_v51, %v435_v17  ;;  %v391_v17 = vsel %vm384_vm2, 0.0, %v1460_v8 }
 0x127   : > { %1106 = vset.pattern.permute.xlu1 %v1245_v6 }
 0x128   : > { %837 = vperm.xlu1 %1106, %v1439_v60   ;;  %v450_v27 = vadd.f32 %v446_v22, %v413_v23 }
 0x12b   : > { %659 = vrot.lane.b32.xlu0 %v1394_v48, %s1244_s7 }
 0x12c   : > { %v1484_v10 = vpop.permute.xlu2 %456  ;;  %1104 = vset.pattern.permute.xlu2 %v1246_v16 }
 0x12d   : > { %v1482_v7 = vpop.permute.xlu1 %378  ;;  %v468_v13 = vsel %vm460_vm0, 0.0, %v1484_v10  ;;  %817 = vperm.xlu2 %1104, %v1439_v60  }
 0x12e   : > { %v475_v21 = vsel %vm1487_vm3, %v468_v13, 0.0 }
 0x12f   : > { %v487_v24 = vmul.f32 %v1410_v53, %v475_v21 }
 0x130   : > { %1108 = vset.pattern.permute.xlu1 %v1247_v19 }
 0x131   : > { %857 = vperm.xlu1 %1108, %v1439_v60   ;;  %v491_v33 = vadd.f32 %v487_v24, %v450_v27  ;;  %v397_v27 = vsel %vm1496_vm4, %v391_v17, 0.0 }
 0x133   : > { %729 = vperm.xlu0 %1086, %v1439_v60  }
 0x134   : > { %v1509_v26 = vpop.permute.xlu2 %497 }
 0x135   : > { %v422_v25 = vpop.permute.xlu1 %421  ;;  %v383_v28 = vpop.permute.xlu0 %382  ;;  %v509_v29 = vsel %vm501_vm5, 0.0, %v1509_v26  ;;  %1107 = vset.pattern.permute.xlu2 %v1248_v32 }
 0x136   : > { %v386_v30 = vsel %vm384_vm2, %v381_v0, %v383_v28  ;;  %v512_v31 = vsel %vm1496_vm4, %v509_v29, 0.0  ;;  %847 = vperm.xlu2 %1107, %v1439_v60  }
 0x137   : > { %v524_v34 = vmul.f32 %v1419_v55, %v512_v31  ;;  %v400_v46 = vsel %vm1525_vm6, %v386_v30, 0.0 }
 0x138   : > { %v414_v63 = vmul.f32 %v1400_v49, %v400_v46 }
 0x139   : > { %v528_v36 = vadd.f32 %v524_v34, %v491_v33 }
 0x13b   : > { %1100 = vset.pattern.permute.xlu0 %v1233_v9  ;;  %v1521_v39 = vadd.f32 %v540_v35, %v528_v36 }
 0x13c   : > { %777 = vperm.xlu0 %1100, %v1439_v60   ;;  %v1569_v30 = vpop.permute.xlu2 %546 }
 0x13d   : > { %v455_v41 = vpop.permute.xlu1 %454  ;;  %v420_v42 = vpop.permute.xlu0 %419 }
 0x13e   : > { %1109 = vset.pattern.permute.xlu2 %v1249_v44  ;;  %v428_v21 = vsel %vm427_vm1, %v420_v42, %v422_v25  ;;  %v434_v22 = vsel %vm427_vm1, 0.0, %v420_v42 }
 0x13f   : > { %867 = vperm.xlu2 %1109, %v1439_v60   ;;  %v444_v25 = vmul.f32 %v1414_v54, %v434_v22  ;;  %v445_v28 = vmul.f32 %v1414_v54, %v428_v21 }
 0x144   : > { %1105 = vset.pattern.permute.xlu0 %v1250_v47 }
 0x145   : > { %v496_v9 = vpop.permute.xlu1 %495  ;;  %827 = vperm.xlu0 %1105, %v1439_v60   ;;  %v426_v50 = vpop.permute.xlu0 %425 }
 0x146   : > { %v429_v0 = vsel %vm427_vm1, %v1476_v11, %v426_v50 }
 0x147   : > { %v447_v6 = vmul.f32 %v1404_v51, %v429_v0  ;;  %v385_v51 = vsel %vm384_vm2, %v1460_v8, %v1482_v7  ;;  %v538_v0 = vmul.f32 %v1380_v14, %v1386_v38  ;;  %v541_v14 = vmul.f32 %v1445_v5, %v1394_v48 }
 0x148   : > { %v398_v8 = vsel %vm1525_vm6, %v385_v51, 0.0 }
 0x149   : > { %v451_v2 = vadd.f32 %v447_v6, %v414_v63  ;;  %v412_v31 = vmul.f32 %v1408_v52, %v398_v8  ;;  %v551_v6 = vpop.permute.xlu2 %550 }
 0x14b   : > { %v449_v36 = vadd.f32 %v445_v28, %v412_v31 }
 0x14d   : > { %v1536_v4 = vpop.permute.xlu1 %548  ;;  %1110 = vset.pattern.permute.xlu0 %v1251_v15  ;;  %v453_v13 = vpop.permute.xlu0 %452 }
 0x14e   : > { %877 = vperm.xlu0 %1110, %v1439_v60   ;;  %v461_v11 = vsel %vm460_vm0, %v453_v13, %v455_v41  ;;  %v467_v20 = vsel %vm460_vm0, 0.0, %v453_v13  ;;  %v561_v13 = vsel %vm554_vm8, %v1536_v4, 0.0 }
 0x14f   : > { %v473_v7 = vsel %vm1487_vm3, %v467_v20, 0.0  ;;  %v564_v38 = vsel %vm1543_vm7, %v561_v13, 0.0 }
 0x150   : > { %v485_v32 = vmul.f32 %v1421_v56, %v473_v7 }
 0x155   : > { %v1539_v16 = vpop.permute.xlu1 %585  ;;  %v459_v49 = vpop.permute.xlu0 %458 }
 0x156   : > { %v462_v60 = vsel %vm460_vm0, %v1484_v10, %v459_v49  ;;  %v474_v10 = vsel %vm1543_vm7, %v461_v11, 0.0  ;;  %v576_v11 = vmul.f32 %v1455_v1, %v564_v38 }
 0x157   : > { %v476_v23 = vsel %vm1543_vm7, %v462_v60, 0.0  ;;  %v486_v33 = vmul.f32 %v1421_v56, %v474_v10 }
 0x158   : > { %v488_v24 = vmul.f32 %v1410_v53, %v476_v23  ;;  %v411_v53 = vmul.f32 %v1408_v52, %v397_v27 }
 0x159   : > { %v490_v44 = vadd.f32 %v486_v33, %v449_v36 }
 0x15a   : > { %v492_v29 = vadd.f32 %v488_v24, %v451_v2  ;;  %v448_v35 = vadd.f32 %v444_v25, %v411_v53 }
 0x15c   : > { %v489_v52 = vadd.f32 %v485_v32, %v448_v35 }
 0x15d   : > { %v494_v34 = vpop.permute.xlu0 %493  ;;  %v1575_v37 = vpop.permute.xlu1 %622 }
 0x15e   : > { %v502_v41 = vsel %vm501_vm5, %v494_v34, %v496_v9  ;;  %v508_v54 = vsel %vm501_vm5, 0.0, %v494_v34  ;;  %v635_v22 = vsel %vm628_vm11, %v1575_v37, 0.0 }
 0x15f   : > { %v510_v42 = vsel %vm1496_vm4, %v508_v54, 0.0  ;;  %v511_v43 = vsel %vm1525_vm6, %v502_v41, 0.0  ;;  %v646_v8 = vmul.f32 %v1471_v3, %v635_v22  ;;  %v555_v41 = vsel %vm554_vm8, %v1569_v30, %v1536_v4 }
 0x160   : > { %v522_v46 = vmul.f32 %v1432_v58, %v510_v42  ;;  %v523_v56 = vmul.f32 %v1432_v58, %v511_v43 }
 0x162   : > { %v526_v47 = vadd.f32 %v522_v46, %v489_v52  ;;  %v527_v50 = vadd.f32 %v523_v56, %v490_v44  ;;  %v563_v44 = vsel %vm1487_vm3, %v555_v41, 0.0 }
 0x163   : > { %v575_v30 = vmul.f32 %v1455_v1, %v563_v44 }
 0x164   : > { %v542_v9 = vadd.f32 %v538_v0, %v526_v47  ;;  %v543_v63 = vadd.f32 %v1390_v40, %v527_v50 }
 0x165   : > { %v500_v2 = vpop.permute.xlu0 %499  ;;  %v656_v17 = vpop.permute.xlu1 %655 }
 0x166   : > { %v503_v15 = vsel %vm501_vm5, %v1509_v26, %v500_v2  ;;  %v598_v26 = vsel %vm591_vm9, %v1539_v16, 0.0  ;;  %v580_v21 = vadd.f32 %v576_v11, %v543_v63  ;;  %v668_v5 = vsel %vm661_vm10, %v656_v17, 0.0 }
 0x167   : > { %v513_v58 = vsel %vm1525_vm6, %v503_v15, 0.0  ;;  %v601_v60 = vsel %vm1525_vm6, %v598_v26, 0.0  ;;  %v671_v27 = vsel %vm1543_vm7, %v668_v5, 0.0  ;;  %v579_v15 = vadd.f32 %v575_v30, %v542_v9 }
 0x168   : > { %v525_v49 = vmul.f32 %v1419_v55, %v513_v58  ;;  %v588_v55 = vpop.permute.xlu2 %587  ;;  %v613_v48 = vmul.f32 %v1464_v62, %v601_v60 }
 0x16a   : > { %v529_v40 = vadd.f32 %v525_v49, %v492_v29  ;;  %v617_v24 = vadd.f32 %v613_v48, %v580_v21 }
 0x16c   : > { %v1601_v51 = vadd.f32 %v541_v14, %v529_v40  ;;  %v650_v25 = vadd.f32 %v646_v8, %v617_v24 }
 0x16d   : > { %v553_v20 = vpop.permute.xlu0 %552  ;;  %v676_v23 = vpop.permute.xlu1 %675 }
 0x16e   : > { %v683_v7 = vmul.f32 %v676_v23, %v671_v27  ;;  %v556_v56 = vsel %vm554_vm8, %v551_v6, %v553_v20  ;;  %v562_v47 = vsel %vm554_vm8, %v553_v20, 0.0 }
 0x16f   : > { %v565_v2 = vsel %vm1487_vm3, %v556_v56, 0.0  ;;  %v566_v6 = vsel %vm1543_vm7, %v562_v47, 0.0 }
 0x170   : > { %v625_v28 = vpop.permute.xlu2 %624  ;;  %v687_v29 = vadd.f32 %v683_v7, %v650_v25  ;;  %v577_v40 = vmul.f32 %v1426_v57, %v565_v2  ;;  %v578_v26 = vmul.f32 %v1426_v57, %v566_v6 }
 0x172   : > { %v695_v53 = vmul.f32 %v687_v29, %v687_v29  ;;  %v581_v21 = vadd.f32 %v577_v40, %v1521_v39  ;;  %v582_v48 = vadd.f32 %v578_v26, %v1601_v51  ;;  %v691_v5 = vmul.f32 0.5, %v687_v29 }
 0x174   : > { %v699_v32 = vmul.f32 %v695_v53, %v687_v29 }
 0x175   : > { %v584_v10 = vpop.permute.xlu0 %583 }
 0x176   : > { %v703_v34 = vmul.f32 0.044715, %v699_v32  ;;  %v592_v54 = vsel %vm591_vm9, %v584_v10, %v1539_v16  ;;  %v1630_v50 = vpop.permute.xlu1 %737 }
 0x177   : > { %v600_v46 = vsel %vm1496_vm4, %v592_v54, 0.0 }
 0x178   : > { %v1613_v33 = vpop.permute.xlu2 %679  ;;  %v707_v36 = vadd.f32 %v703_v34, %v687_v29  ;;  %v612_v16 = vmul.f32 %v1464_v62, %v600_v46 }
 0x17a   : > { %v711_v43 = vmul.f32 0.7978846, %v707_v36  ;;  %v616_v58 = vadd.f32 %v612_v16, %v579_v15 }
 0x17c   : > { %1119 = vtanh.f32 %v711_v43 }
 0x17d   : > { %v590_v31 = vpop.permute.xlu0 %589 }
 0x17e   : > { %v593_v0 = vsel %vm591_vm9, %v588_v55, %v590_v31  ;;  %v599_v63 = vsel %vm591_vm9, %v590_v31, 0.0 }
 0x17f   : > { %v602_v62 = vsel %vm1496_vm4, %v593_v0, 0.0  ;;  %v603_v49 = vsel %vm1525_vm6, %v599_v63, 0.0  ;;  %v1658_v8 = vpop.permute.xlu1 %757 }
 0x180   : > { %v658_v42 = vpop.permute.xlu2 %657  ;;  %v614_v18 = vmul.f32 %v1434_v59, %v602_v62  ;;  %v615_v60 = vmul.f32 %v1434_v59, %v603_v49 }
 0x182   : > { %v1120_v38 = vpop.eup %1119  ;;  %v618_v27 = vadd.f32 %v614_v18, %v581_v21 }
 0x183   : > { %v719_v55 = vadd.f32 1.0, %v1120_v38 }
 0x185   : > { %v621_v35 = vpop.permute.xlu0 %620  ;;  %v1660_v59 = vmul.f32 %v719_v55, %v691_v5 }
 0x186   : > { %v629_v4 = vsel %vm628_vm11, %v621_v35, %v1575_v37 }
 0x187   : > { %v645_v13 = vmul.f32 %v1471_v3, %v629_v4  ;;  %v741_v35 = vperm.slane %v1660_v59, 1  ;;  %v733_v12 = vperm.slane %v1660_v59, 0  ;;  %v761_v19 = vperm.slane %v1660_v59, 3 }
 0x188   : > { %v1639_v37 = vpop.permute.xlu2 %747  ;;  %v1677_v4 = vpop.permute.xlu1 %787 }
 0x189   : > { %v649_v9 = vadd.f32 %v645_v13, %v616_v58  ;;  %v743_v56 = vmul.f32 %v741_v35, %v1630_v50  ;;  %v763_v15 = vmul.f32 %v761_v19, %v1658_v8  ;;  %v771_v13 = vperm.slane %v1660_v59, 4 }
 0x18d   : > { %v627_v52 = vpop.permute.xlu0 %626 }
 0x18e   : > { %v630_v11 = vsel %vm628_vm11, %v625_v28, %v627_v52  ;;  %v636_v45 = vsel %vm628_vm11, %v627_v52, 0.0 }
 0x18f   : > { %v647_v57 = vmul.f32 %v1447_v61, %v630_v11  ;;  %v648_v22 = vmul.f32 %v1447_v61, %v636_v45 }
 0x190   : > { %v1664_v28 = vpop.permute.xlu2 %767 }
 0x191   : > { %v651_v51 = vadd.f32 %v647_v57, %v618_v27 }
 0x195   : > { %v654_v1 = vpop.permute.xlu0 %653 }
 0x196   : > { %v662_v14 = vsel %vm661_vm10, %v654_v1, %v656_v17 }
 0x197   : > { %v670_v3 = vsel %vm1487_vm3, %v662_v14, 0.0 }
 0x198   : > { %v682_v20 = vmul.f32 %v676_v23, %v670_v3  ;;  %v619_v23 = vadd.f32 %v615_v60, %v582_v48  ;;  %v1680_v2 = vpop.permute.xlu2 %797  ;;  %v808_v60 = vpop.permute.xlu1 %807 }
 0x19a   : > { %v686_v17 = vadd.f32 %v682_v20, %v649_v9  ;;  %v652_v53 = vadd.f32 %v648_v22, %v619_v23  ;;  %v773_v9 = vmul.f32 %v771_v13, %v1664_v28  ;;  %v781_v20 = vperm.slane %v1660_v59, 5 }
 0x19b   : > { %v791_v22 = vperm.slane %v1660_v59, 6 }
 0x19c   : > { %v694_v24 = vmul.f32 %v686_v17, %v686_v17  ;;  %v690_v40 = vmul.f32 0.5, %v686_v17 }
 0x19d   : > { %v660_v7 = vpop.permute.xlu0 %659 }
 0x19e   : > { %v698_v10 = vmul.f32 %v694_v24, %v686_v17  ;;  %v663_v25 = vsel %vm661_vm10, %v658_v42, %v660_v7  ;;  %v669_v39 = vsel %vm661_vm10, %v660_v7, 0.0  ;;  %v751_v42 = vperm.slane %v1660_v59, 2 }
 0x19f   : > { %v672_v29 = vsel %vm1487_vm3, %v663_v25, 0.0  ;;  %v673_v61 = vsel %vm1543_vm7, %v669_v39, 0.0 }
 0x1a0   : > { %v702_v31 = vmul.f32 0.044715, %v698_v10  ;;  %v684_v32 = vmul.f32 %v1613_v33, %v672_v29  ;;  %v685_v34 = vmul.f32 %v1613_v33, %v673_v61  ;;  %v753_v16 = vmul.f32 %v751_v42, %v1639_v37  ;;  %v818_v5 = vpop.permute.xlu2 %817 }
 0x1a1   : > { %v793_v61 = vmul.f32 %v791_v22, %v1677_v4 }
 0x1a2   : > { %v706_v36 = vadd.f32 %v702_v31, %v686_v17  ;;  %v688_v41 = vadd.f32 %v684_v32, %v651_v51  ;;  %v689_v54 = vadd.f32 %v685_v34, %v652_v53  ;;  %v801_v53 = vperm.slane %v1660_v59, 7 }
 0x1a4   : > { %v710_v43 = vmul.f32 0.7978846, %v706_v36  ;;  %v696_v52 = vmul.f32 %v688_v41, %v688_v41  ;;  %v697_v44 = vmul.f32 %v689_v54, %v689_v54  ;;  %v693_v31 = vmul.f32 0.5, %v689_v54 }
 0x1a5   : > { %v730_v46 = vpop.permute.xlu0 %729  ;;  %v692_v34 = vmul.f32 0.5, %v688_v41 }
 0x1a6   : > { %1121 = vtanh.f32 %v710_v43  ;;  %v700_v47 = vmul.f32 %v696_v52, %v688_v41  ;;  %v735_v33 = vmul.f32 %v733_v12, %v730_v46  ;;  %v701_v30 = vmul.f32 %v697_v44, %v689_v54  ;;  %v838_v44 = vpop.permute.xlu1 %837 }
 0x1a8   : > { %v704_v0 = vmul.f32 0.044715, %v700_v47  ;;  %v745_v63 = vadd.f32 %v743_v56, %v735_v33  ;;  %v705_v6 = vmul.f32 0.044715, %v701_v30  ;;  %v848_v47 = vpop.permute.xlu2 %847 }
 0x1aa   : > { %v708_v1 = vadd.f32 %v704_v0, %v688_v41  ;;  %v755_v58 = vadd.f32 %v753_v16, %v745_v63  ;;  %v709_v62 = vadd.f32 %v705_v6, %v689_v54 }
 0x1ac   : > { %v1122_v49 = vpop.eup %1121  ;;  %v712_v14 = vmul.f32 0.7978846, %v708_v1  ;;  %v765_v38 = vadd.f32 %v763_v15, %v755_v58  ;;  %v713_v3 = vmul.f32 0.7978846, %v709_v62 }
 0x1ad   : > { %v718_v26 = vadd.f32 1.0, %v1122_v49 }
 0x1ae   : > { %1123 = vtanh.f32 %v712_v14  ;;  %v778_v11 = vpop.permute.xlu0 %777  ;;  %v775_v45 = vadd.f32 %v773_v9, %v765_v38 }
 0x1af   : > { %v722_v18 = vmul.f32 %v718_v26, %v690_v40  ;;  %1125 = vtanh.f32 %v713_v3  ;;  %v783_v55 = vmul.f32 %v781_v20, %v778_v11 }
 0x1b1   : > { %v732_v21 = vperm.slane %v722_v18, 0  ;;  %v740_v48 = vperm.slane %v722_v18, 1  ;;  %v750_v57 = vperm.slane %v722_v18, 2  ;;  %v760_v27 = vperm.slane %v722_v18, 3 }
 0x1b2   : > { %v785_v7 = vadd.f32 %v783_v55, %v775_v45  ;;  %v770_v29 = vperm.slane %v722_v18, 4  ;;  %v790_v19 = vperm.slane %v722_v18, 6 }
 0x1b3   : > { %v734_v17 = vmul.f32 %v732_v21, %v730_v46  ;;  %v742_v24 = vmul.f32 %v740_v48, %v1630_v50  ;;  %v752_v51 = vmul.f32 %v750_v57, %v1639_v37  ;;  %v762_v36 = vmul.f32 %v760_v27, %v1658_v8  ;;  %v858_v21 = vpop.permute.xlu1 %857 }
 0x1b4   : > { %v1124_v23 = vpop.eup %1123  ;;  %v780_v50 = vperm.slane %v722_v18, 5  ;;  %v795_v43 = vadd.f32 %v793_v61, %v785_v7  ;;  %v772_v37 = vmul.f32 %v770_v29, %v1664_v28  ;;  %v803_v46 = vmul.f32 %v801_v53, %v1680_v2 }
 0x1b5   : > { %v1126_v10 = vpop.eup %1125  ;;  %v720_v25 = vadd.f32 1.0, %v1124_v23  ;;  %v744_v39 = vadd.f32 %v742_v24, %v734_v17  ;;  %v800_v8 = vperm.slane %v722_v18, 7  ;;  %v792_v63 = vmul.f32 %v790_v19, %v1677_v4  ;;  %v868_v24 = vpop.permute.xlu2 %867 }
 0x1b6   : > { %v721_v32 = vadd.f32 1.0, %v1126_v10  ;;  %v782_v56 = vmul.f32 %v780_v50, %v778_v11  ;;  %v805_v30 = vadd.f32 %v803_v46, %v795_v43 }
 0x1b7   : > { %v754_v35 = vadd.f32 %v752_v51, %v744_v39  ;;  %v1694_v52 = vmul.f32 %v720_v25, %v692_v34  ;;  %v828_v28 = vpop.permute.xlu0 %827  ;;  %v802_v49 = vmul.f32 %v800_v8, %v1680_v2 }
 0x1b8   : > { %v1692_v42 = vmul.f32 %v721_v32, %v693_v31 }
 0x1b9   : > { %v764_v12 = vadd.f32 %v762_v36, %v754_v35  ;;  %v810_v16 = vperm.slane %v1694_v52, 0  ;;  %v820_v58 = vperm.slane %v1694_v52, 1  ;;  %v830_v4 = vperm.slane %v1694_v52, 2 }
 0x1ba   : > { %v811_v59 = vperm.slane %v1692_v42, 0  ;;  %v821_v41 = vperm.slane %v1692_v42, 1  ;;  %v831_v6 = vperm.slane %v1692_v42, 2  ;;  %v841_v13 = vperm.slane %v1692_v42, 3 }
 0x1bb   : > { %v774_v54 = vadd.f32 %v772_v37, %v764_v12  ;;  %v851_v14 = vperm.slane %v1692_v42, 4  ;;  %v812_v26 = vmul.f32 %v810_v16, %v808_v60  ;;  %v861_v20 = vperm.slane %v1692_v42, 5 }
 0x1bc   : > { %v813_v33 = vmul.f32 %v811_v59, %v808_v60  ;;  %v823_v15 = vmul.f32 %v821_v41, %v818_v5  ;;  %v833_v40 = vmul.f32 %v831_v6, %v828_v28  ;;  %v843_v9 = vmul.f32 %v841_v13, %v838_v44 }
 0x1bd   : > { %v784_v0 = vadd.f32 %v782_v56, %v774_v54  ;;  %v822_v18 = vmul.f32 %v820_v58, %v818_v5  ;;  %v840_v45 = vperm.slane %v1694_v52, 3  ;;  %v853_v48 = vmul.f32 %v851_v14, %v848_v47 }
 0x1be   : > { %v815_v1 = vadd.f32 %v813_v33, %v805_v30  ;;  %v871_v57 = vperm.slane %v1692_v42, 6  ;;  %v850_v22 = vperm.slane %v1694_v52, 4  ;;  %v832_v17 = vmul.f32 %v830_v4, %v828_v28 }
 0x1bf   : > { %v794_v62 = vadd.f32 %v792_v63, %v784_v0  ;;  %v863_v23 = vmul.f32 %v861_v20, %v858_v21  ;;  %v842_v7 = vmul.f32 %v840_v45, %v838_v44  ;;  %v860_v10 = vperm.slane %v1694_v52, 5 }
 0x1c0   : > { %v825_v38 = vadd.f32 %v823_v15, %v815_v1  ;;  %v878_v25 = vpop.permute.xlu0 %877  ;;  %v873_v51 = vmul.f32 %v871_v57, %v868_v24  ;;  %v881_v29 = vperm.slane %v1692_v42, 7  ;;  %v852_v61 = vmul.f32 %v850_v22, %v848_v47 }
 0x1c1   : > { %v804_v3 = vadd.f32 %v802_v49, %v794_v62  ;;  %v870_v31 = vperm.slane %v1694_v52, 6  ;;  %v862_v36 = vmul.f32 %v860_v10, %v858_v21  ;;  %v880_v42 = vperm.slane %v1694_v52, 7 }
 0x1c2   : > { %v835_v11 = vadd.f32 %v833_v40, %v825_v38  ;;  %v883_v34 = vmul.f32 %v881_v29, %v878_v25 }
 0x1c3   : > { %v814_v55 = vadd.f32 %v812_v26, %v804_v3  ;;  %v872_v12 = vmul.f32 %v870_v31, %v868_v24  ;;  %v882_v19 = vmul.f32 %v880_v42, %v878_v25 }
 0x1c4   : > { %v845_v2 = vadd.f32 %v843_v9, %v835_v11 }
 0x1c5   : > { %v824_v60 = vadd.f32 %v822_v18, %v814_v55 }
 0x1c6   : > { %v855_v27 = vadd.f32 %v853_v48, %v845_v2 }
 0x1c7   : > { %v834_v5 = vadd.f32 %v832_v17, %v824_v60 }
 0x1c8   : > { %v865_v39 = vadd.f32 %v863_v23, %v855_v27 }
 0x1c9   : > { %v844_v53 = vadd.f32 %v842_v7, %v834_v5 }
 0x1ca   : > { %v875_v32 = vadd.f32 %v873_v51, %v865_v39 }
 0x1cb   : > { %v854_v35 = vadd.f32 %v852_v61, %v844_v53 }
 0x1cc   : > { %v885_v50 = vadd.f32 %v883_v34, %v875_v32 }
 0x1cd   : > { %v864_v43 = vadd.f32 %v862_v36, %v854_v35 }
 0x1ce   : > { %v888_v46 = vrot.slane %v885_v50, 4 }
 0x1cf   : > { %v874_v37 = vadd.f32 %v872_v12, %v864_v43 }
 0x1d1   : > { %v884_v44 = vadd.f32 %v882_v19, %v874_v37 }
 0x1d3   : > { %v890_v59 = vsel %vm889_vm12, %v884_v44, %v888_v46 }
 0x1d4   : > { %892 = vst [vmem:[%s207_s22] sm:$0xff] %v890_v59 }
 0x1d5   : > { %1184 = shalt.err (!%p1181_p8)
}
 0x1d6   : > { %1001 = dma.vmem_to_hbm [thread:$0]  (%p1315_p5), %s908_s23, 128, %s910_s19, %s894_s27  }
 0x1d7 PF: > { %p1013_p9 = scmp.ge.s32.totalorder %s1223_s18, 2  ;;  %s921_s9 = sand.u32 1, %s1211_s15  }
 0x1d8   : > { %s922_s10 = scalar_lea.sflag [#allocation4], %s921_s9 }
 0x1d9   : > { %p1008_p10 = pnand %p1013_p9, %p1319_p6 }
 0x1db   : > { %p1009_p11 = pneg %p1008_p10 }
 0x1dd   : > { %1206 = dma.done.wait (%p1009_p11), %s922_s10, 128  }
 0x1de   : > { %1208 = vsyncadd (%p1009_p11), %s922_s10, 4294967168  ;;  %p15_p12 = scmp.ge.s32.totalorder %s1302_s21, 4   ;;  %s1767_s15 = smov %s1215_s16 }
 0x1df   : > { %s1768_s16 = smov %s1219_s17  ;;  %s1769_s17 = smov %s1313_s24 }
 0x1e0   : > { %s1770_s18 = smov %s1302_s21  ;;  %17 = sbr.rel (!%p15_p12) target bundleno = 4 (0x4), region = 76 }
 0x1e5   :  { %928 = vsyncpa [#allocation3], 1 }
 0x1e6   :  { %930 = vsyncpa [#allocation3 + $0x1], 1 }
 0x1e7   :  { %931 = vsyncpa [#allocation4], 1 }
 0x1e8   :  { %933 = vsyncpa [#allocation4 + $0x1], 1 }

</bundles_post_ra>
